<compile_context>
chip_gen: v6e
topology: v6e:2x2x1
jax: 0.10.0
libtpu: 0.0.40
codegen_flags: <defaults>
</compile_context>

<pallas_src>
import functools

import jax
import jax.numpy as jnp
from jax.experimental import pallas as pl
from jax.experimental.pallas import tpu as pltpu


def _round_up(x, m):
    return ((x + m - 1) // m) * m


def linear_relu_kernel(x_ref, w_ref, b_ref, o_ref, acc_ref):
    # x_ref: (tm, tk), w_ref: (tk, tn), b_ref: (1, tn),
    # o_ref: (tm, tn), acc_ref: (tm, tn) f32 scratch
    k = pl.program_id(2)

    @pl.when(k == 0)
    def _zero_acc():
        acc_ref[...] = jnp.zeros_like(acc_ref)

    acc_ref[...] += jnp.dot(
        x_ref[...], w_ref[...], preferred_element_type=jnp.float32
    )

    @pl.when(k == pl.num_programs(2) - 1)
    def _finalize():
        out = acc_ref[...] + b_ref[...]          # bias broadcast (1, tn)
        o_ref[...] = jnp.maximum(out, 0.0).astype(o_ref.dtype)


@functools.partial(
    jax.jit, static_argnames=("tile_m", "tile_n", "tile_k", "compute_dtype")
)
def linear_relu(
    x,
    w_t,
    b,
    *,
    tile_m: int = 256,
    tile_n: int = 256,
    tile_k: int = 512,
    compute_dtype=jnp.bfloat16,
):
    """y = relu(x @ w_t + b).

    x:   (M, K)  float32
    w_t: (K, N)  float32 (weight already transposed, i.e. W^T)
    b:   (N,)    float32
    """
    M, K = x.shape
    K2, N = w_t.shape
    assert K == K2, (K, K2)
    assert b.shape == (N,)
    out_dtype = x.dtype

    # Sublane / lane alignment: 16 rows for 2-byte dtypes, 8 for f32; 128 lanes.
    sub = 16 if jnp.dtype(compute_dtype).itemsize == 2 else 8
    tm = min(tile_m, _round_up(M, sub))
    tn = min(tile_n, _round_up(N, 128))
    tk = min(tile_k, _round_up(K, 128))

    Mp = _round_up(M, tm)
    Kp = _round_up(K, tk)
    Np = _round_up(N, tn)

    # Cast matmul operands to the compute dtype (halves weight HBM traffic),
    # zero-pad ragged dims (zeros contribute nothing to the reduction).
    xp = x.astype(compute_dtype)
    wp = w_t.astype(compute_dtype)
    if (Mp, Kp) != (M, K):
        xp = jnp.pad(xp, ((0, Mp - M), (0, Kp - K)))
    if (Kp, Np) != (K, N):
        wp = jnp.pad(wp, ((0, Kp - K), (0, Np - N)))
    bp = b.astype(jnp.float32).reshape(1, N)
    if Np != N:
        bp = jnp.pad(bp, ((0, 0), (0, Np - N)))

    grid = (Mp // tm, Np // tn, Kp // tk)

    itemsize_in = jnp.dtype(compute_dtype).itemsize
    itemsize_out = jnp.dtype(out_dtype).itemsize
    cost = pl.CostEstimate(
        flops=2 * Mp * Np * Kp,
        bytes_accessed=(
            Mp * Kp * itemsize_in
            + Kp * Np * itemsize_in
            + Np * 4
            + Mp * Np * itemsize_out
        ),
        transcendentals=0,
    )

    out = pl.pallas_call(
        linear_relu_kernel,
        out_shape=jax.ShapeDtypeStruct((Mp, Np), out_dtype),
        grid_spec=pltpu.PrefetchScalarGridSpec(
            num_scalar_prefetch=0,
            grid=grid,
            in_specs=[
                pl.BlockSpec((tm, tk), lambda i, j, k: (i, k)),  # x tile
                pl.BlockSpec((tk, tn), lambda i, j, k: (k, j)),  # weight tile
                pl.BlockSpec((1, tn), lambda i, j, k: (0, j)),   # bias tile
            ],
            out_specs=pl.BlockSpec((tm, tn), lambda i, j, k: (i, j)),
            scratch_shapes=[pltpu.VMEM((tm, tn), jnp.float32)],
        ),
        compiler_params=pltpu.CompilerParams(
            dimension_semantics=("parallel", "parallel", "arbitrary"),
            vmem_limit_bytes=64 * 1024 * 1024,
        ),
        cost_estimate=cost,
    )(xp, wp, bp)

    if (Mp, Np) != (M, N):
        out = out[:M, :N]
    return out


def _check(key, M, K, N, atol=1e-2, rtol=1e-2):
    kx, kw, kb = jax.random.split(key, 3)
    x = jax.random.normal(kx, (M, K), dtype=jnp.float32)
    bound = 1.0 / (K ** 0.5)
    weight = jax.random.uniform(
        kw, (N, K), minval=-bound, maxval=bound, dtype=jnp.float32
    )
    bias = jax.random.uniform(
        kb, (N,), minval=-bound, maxval=bound, dtype=jnp.float32
    )

    w_t = weight.T  # torch Linear computes x @ W^T + b
    out = jax.block_until_ready(linear_relu(x, w_t, bias))

    # Reference with the same bf16 rounding of the matmul inputs, f32 accum.
    x_r = x.astype(jnp.bfloat16).astype(jnp.float32)
    w_r = w_t.astype(jnp.bfloat16).astype(jnp.float32)
    ref = jnp.maximum(x_r @ w_r + bias[None, :], 0.0)

    assert out.shape == (M, N)
    assert jnp.allclose(out, ref, atol=atol, rtol=rtol), (
        float(jnp.max(jnp.abs(out - ref)))
    )


if __name__ == "__main__":
    key = jax.random.PRNGKey(0)
    k1, k2 = jax.random.split(key)

    # Small shapes matching nn.Linear(in_features=32, out_features=64), batch=8.
    _check(k1, M=8, K=32, N=64)

    # Ragged / multi-tile case: exercises M/N/K tiling, K-accumulation and
    # padding removal (grid = (2, 2, 2) with the default tile sizes).
    _check(k2, M=500, K=1000, N=400)

    print("KERNEL_OK")
</pallas_src>

<mosaic_0001>
module attributes {stable_mosaic.version = 11 : i64} {
  func.func @linear_relu_kernel(%arg0: i32, %arg1: i32, %arg2: i32, %arg3: memref<16x128xbf16, #tpu.memory_space<vmem>>, %arg4: memref<128x128xbf16, #tpu.memory_space<vmem>>, %arg5: memref<1x128xf32, #tpu.memory_space<vmem>>, %arg6: memref<16x128xf32, #tpu.memory_space<vmem>>, %arg7: memref<16x128xf32, #tpu.memory_space<vmem>>) attributes {dimension_semantics = [#tpu.dimension_semantics<parallel>, #tpu.dimension_semantics<parallel>, #tpu.dimension_semantics<arbitrary>], iteration_bounds = array<i64: 1, 1, 1>, scalar_prefetch = 0 : i64, scratch_operands = 1 : i64, tpu.core_type = #tpu.core_type<tc>, window_params = [{transform_indices = @transform_0, window_bounds = array<i64: 16, 128>}, {transform_indices = @transform_1, window_bounds = array<i64: 128, 128>}, {transform_indices = @transform_2, window_bounds = array<i64: 1, 128>}, {transform_indices = @transform_3, window_bounds = array<i64: 16, 128>}]} {
    %c0_i32 = arith.constant 0 : i32
    %0 = arith.cmpi eq, %arg2, %c0_i32 : i32
    %1 = arith.extui %0 : i1 to i32
    %c0_i32_0 = arith.constant 0 : i32
    %2 = arith.cmpi ne, %1, %c0_i32_0 : i32
    scf.if %2 {
      %cst_10 = arith.constant 0.000000e+00 : f32
      %12 = vector.broadcast %cst_10 : f32 to vector<16x128xf32>
      %c0_11 = arith.constant 0 : index
      %c0_12 = arith.constant 0 : index
      %13 = vector.load %arg7[%c0_11, %c0_12] : memref<16x128xf32, #tpu.memory_space<vmem>>, vector<16x128xf32>
      tpu.vector_store %arg7[%c0_11, %c0_12], %12 {strides = array<i32>} : memref<16x128xf32, #tpu.memory_space<vmem>>, vector<16x128xf32>,
    } else {
    }
    %c0 = arith.constant 0 : index
    %c0_1 = arith.constant 0 : index
    %3 = vector.load %arg7[%c0, %c0_1] : memref<16x128xf32, #tpu.memory_space<vmem>>, vector<16x128xf32>
    %c0_2 = arith.constant 0 : index
    %c0_3 = arith.constant 0 : index
    %4 = vector.load %arg3[%c0_2, %c0_3] : memref<16x128xbf16, #tpu.memory_space<vmem>>, vector<16x128xbf16>
    %c0_4 = arith.constant 0 : index
    %c0_5 = arith.constant 0 : index
    %5 = vector.load %arg4[%c0_4, %c0_5] : memref<128x128xbf16, #tpu.memory_space<vmem>>, vector<128x128xbf16>
    %cst = arith.constant dense<0.000000e+00> : vector<16x128xf32>
    %6 = tpu.matmul %4, %5, %cst {dimension_numbers = #tpu.dot_dimension_numbers<[1], [0], [0], [1], [0, 0, 1, 1], [], []>} : vector<16x128xbf16>, vector<128x128xbf16>, vector<16x128xf32> -> vector<16x128xf32>
    %7 = arith.addf %3, %6 : vector<16x128xf32>
    %c0_6 = arith.constant 0 : index
    %c0_7 = arith.constant 0 : index
    %8 = vector.load %arg7[%c0_6, %c0_7] : memref<16x128xf32, #tpu.memory_space<vmem>>, vector<16x128xf32>
    tpu.vector_store %arg7[%c0_6, %c0_7], %7 {strides = array<i32>} : memref<16x128xf32, #tpu.memory_space<vmem>>, vector<16x128xf32>,
    %c0_i32_8 = arith.constant 0 : i32
    %9 = arith.cmpi eq, %arg2, %c0_i32_8 : i32
    %10 = arith.extui %9 : i1 to i32
    %c0_i32_9 = arith.constant 0 : i32
    %11 = arith.cmpi ne, %10, %c0_i32_9 : i32
    scf.if %11 {
      %c0_10 = arith.constant 0 : index
      %c0_11 = arith.constant 0 : index
      %12 = vector.load %arg7[%c0_10, %c0_11] : memref<16x128xf32, #tpu.memory_space<vmem>>, vector<16x128xf32>
      %c0_12 = arith.constant 0 : index
      %c0_13 = arith.constant 0 : index
      %13 = vector.load %arg5[%c0_12, %c0_13] : memref<1x128xf32, #tpu.memory_space<vmem>>, vector<1x128xf32>
      %14 = vector.broadcast %13 : vector<1x128xf32> to vector<16x128xf32>
      %15 = arith.addf %12, %14 : vector<16x128xf32>
      %cst_14 = arith.constant 0.000000e+00 : f32
      %16 = vector.broadcast %cst_14 : f32 to vector<16x128xf32>
      %17 = arith.maximumf %15, %16 : vector<16x128xf32>
      %c0_15 = arith.constant 0 : index
      %c0_16 = arith.constant 0 : index
      %18 = vector.load %arg6[%c0_15, %c0_16] : memref<16x128xf32, #tpu.memory_space<vmem>>, vector<16x128xf32>
      tpu.vector_store %arg6[%c0_15, %c0_16], %17 {strides = array<i32>} : memref<16x128xf32, #tpu.memory_space<vmem>>, vector<16x128xf32>,
    } else {
    }
    return
  }
  func.func @transform_0(%arg0: i32, %arg1: i32, %arg2: i32) -> (i32, i32) {
    %c0_i32 = arith.constant 0 : i32
    return %arg0, %arg2 : i32, i32
  }
  func.func @transform_1(%arg0: i32, %arg1: i32, %arg2: i32) -> (i32, i32) {
    %c0_i32 = arith.constant 0 : i32
    return %arg2, %arg1 : i32, i32
  }
  func.func @transform_2(%arg0: i32, %arg1: i32, %arg2: i32) -> (i32, i32) {
    %c0_i32 = arith.constant 0 : i32
    %c0_i32_0 = arith.constant 0 : i32
    return %c0_i32, %arg1 : i32, i32
  }
  func.func @transform_3(%arg0: i32, %arg1: i32, %arg2: i32) -> (i32, i32) {
    %c0_i32 = arith.constant 0 : i32
    return %arg0, %arg1 : i32, i32
  }
}

</mosaic_0001>

<bundles_post_ra>
// kernel: linear_relu.1
= control target key start
LH: loop header
LB: loop body
LE: loop exit
PB: predicated region body
PF: predicated region fallthrough
CT: control target
= control target key end

     0   :  { %v212_v0 = vmov 0.0   ;;  %vm213_vm0 = vmmov 0   ;;  %s270_s1 = inlined_call_operand.vmem [shape: bf16[128,128], index: 1, kind: input, shape index: {}]   ;;  %s271_s0 = inlined_call_operand.vmem [shape: bf16[16,128], index: 0, kind: input, shape index: {}]   ;;  %s272_s2 = inlined_call_operand.vmem [shape: f32[1,128], index: 2, kind: input, shape index: {}]   ;;  %s273_s3 = inlined_call_operand.vmem [shape: f32[16,128], index: 3, kind: output, shape index: {}]  }
   0x1   :  { %181 = vmatprep.subr.bf16.mxu0 %v212_v0  ;;  %v203_v1 = vld [vmem:[%s270_s1 + $0x38] sm:$0xff]   ;;  %197 = vmatprep.mubr.msk.bf16.mxu0 %vm213_vm0, %v212_v0  ;;  %v204_v2 = vld [vmem:[%s270_s1 + $0x30] sm:$0xff]   ;;  %v205_v3 = vld [vmem:[%s270_s1 + $0x28] sm:$0xff]  }
   0x2   :  { %182 = vmatpush3.bf16.msra.mxu0 %v203_v1  ;;  %v206_v4 = vld [vmem:[%s270_s1 + $0x20] sm:$0xff]   ;;  %v207_v5 = vld [vmem:[%s270_s1 + $0x18] sm:$0xff]   ;;  %v208_v6 = vld [vmem:[%s270_s1 + $0x10] sm:$0xff]  }
   0x3   :  { %183 = vmatprep.subr.bf16.mxu0 %v212_v0  ;;  %v209_v7 = vld [vmem:[%s270_s1 + $0x8] sm:$0xff]   ;;  %v210_v8 = vld [vmem:[%s270_s1] sm:$0xff]  }
   0x4   :  { %v211_v9 = vld [vmem:[%s271_s0] sm:$0xff]  }
   0x5   :  { %v171_v10 = vld [vmem:[%s272_s2] ss:$0 sm:$0xff] }
   0x6   :  { %184 = vmatpush3.bf16.msra.mxu0 %v204_v2 }
   0x7   :  { %185 = vmatprep.subr.bf16.mxu0 %v212_v0 }
   0xa   :  { %186 = vmatpush3.bf16.msra.mxu0 %v205_v3 }
   0xb   :  { %187 = vmatprep.subr.bf16.mxu0 %v212_v0 }
   0xe   :  { %188 = vmatpush3.bf16.msra.mxu0 %v206_v4 }
   0xf   :  { %189 = vmatprep.subr.bf16.mxu0 %v212_v0 }
  0x12   :  { %190 = vmatpush3.bf16.msra.mxu0 %v207_v5 }
  0x13   :  { %191 = vmatprep.subr.bf16.mxu0 %v212_v0 }
  0x16   :  { %192 = vmatpush3.bf16.msra.mxu0 %v208_v6 }
  0x17   :  { %193 = vmatprep.subr.bf16.mxu0 %v212_v0 }
  0x1a   :  { %194 = vmatpush3.bf16.msra.mxu0 %v209_v7 }
  0x1b   :  { %195 = vmatprep.subr.bf16.mxu0 %v212_v0 }
  0x1e   :  { %196 = vmatpush3.bf16.msra.mxu0 %v210_v8 }
  0x21   :  { %198 = vmatmul.mubr.bf16.vlgmr.msra.gmra.mxu0 %v211_v9 }
  0xe1   :  { %v129_v11 = vpop.f32.mrf.mxu0 }
  0xe2   :  { %v152_v12 = vadd.f32 %v171_v10, %v129_v11 }
  0xe3   :  { %v199_v13 = vpop.f32.mrf.mxu0 }
  0xe4   :  { %v154_v14 = vmax.f32 %v152_v12, 0.0 }
  0xe5   :  { %v132_v15 = vpop.f32.mrf.mxu0 }
  0xe6   :  { %156 = vst [vmem:[%s273_s3] sm:$0xff] %v154_v14  ;;  %v153_v16 = vadd.f32 %v171_v10, %v132_v15 }
  0xe7   :  { %v200_v17 = vpop.f32.mrf.mxu0 }
  0xe8   :  { %v155_v18 = vmax.f32 %v153_v16, 0.0 }
  0xea   :  { %157 = vst [vmem:[%s273_s3 + $0x8] sm:$0xff] %v155_v18 }

</bundles_post_ra>
